<compile_context>
chip_gen: v5e
topology: v5e:2x2
jax: 0.10.0
libtpu: 0.0.40
codegen_flags: <defaults>
</compile_context>

<pallas_src>
import functools

import jax
import jax.numpy as jnp
import numpy as np
from jax.experimental import pallas as pl
from jax.experimental.pallas import tpu as pltpu


# ---------------------------------------------------------------------------
# Fused Pallas kernel: weight generation + K*K involution MAC
# ---------------------------------------------------------------------------
def _involution_fused_kernel(xw_ref, w1t_ref, s_ref, t_ref, w2t_ref, b2t_ref,
                             patches_ref, o_ref, *, K, G, GC):
    # xw_ref      : (C, TS)       weight-branch input (channels x spatial tile)
    # w1t_ref     : (Cr, C)       conv1 weight, transposed
    # s_ref/t_ref : (Cr, 1)       eval-mode BN folded scale / shift
    # w2t_ref     : (K*K*G, Cr)   conv2 weight, transposed + tap-major rows
    # b2t_ref     : (K*K*G, 1)    conv2 bias, tap-major
    # patches_ref : (K*K, C, TS)  pre-shifted taps (im2col layout)
    # o_ref       : (C, TS)
    TS = o_ref.shape[-1]
    KK = K * K

    # ---- weight generation: tiny MXU matmuls, hidden under the VPU MAC ----
    h = jnp.dot(w1t_ref[...], xw_ref[...], preferred_element_type=jnp.float32)
    h = jnp.maximum(h * s_ref[...] + t_ref[...], 0.0)
    wk = jnp.dot(w2t_ref[...], h, preferred_element_type=jnp.float32) + b2t_ref[...]
    wk = wk.reshape(KK, G, 1, TS)            # tap-major rows -> free reshape

    # ---- K*K multiply-accumulate on lane-dense (channels, spatial) tiles ----
    acc = jnp.zeros((G, GC, TS), jnp.float32)
    for tap in range(KK):                    # static unroll (K*K FMAs, VPU)
        p = patches_ref[tap].astype(jnp.float32).reshape(G, GC, TS)
        acc = acc + p * wk[tap]              # (G,1,TS) sublane-broadcast
    o_ref[...] = acc.reshape(G * GC, TS).astype(o_ref.dtype)


# ---------------------------------------------------------------------------
# Wrapper
# ---------------------------------------------------------------------------
def involution_forward(x, params, *, kernel_size, stride=1, dilation=1,
                       group_channels=16):
    B, C, H, W = x.shape
    K = kernel_size
    KK = K * K
    G = C // group_channels
    GC = group_channels
    Hout, Wout = H // stride, W // stride
    S = Hout * Wout

    w1, bn_scale, bn_bias, w2, b2 = params
    Cr = w1.shape[1]
    KKG = KK * G

    # ---- parameter re-layouts (tiny, done once per call) -------------------
    w1t = jnp.asarray(w1).T                                   # (Cr, C)
    s_col = jnp.asarray(bn_scale).reshape(Cr, 1)
    t_col = jnp.asarray(bn_bias).reshape(Cr, 1)
    # conv2 output channel index is g*KK + (i*K + j); reorder to tap-major
    # (tap*G + g) so the kernel can index taps along the leading dim for free.
    perm = np.asarray([g * KK + t for t in range(KK) for g in range(G)],
                      dtype=np.int32)
    w2t = jnp.asarray(w2)[:, perm].T                          # (KKG, Cr)
    b2t = jnp.asarray(b2).reshape(KKG)[perm].reshape(KKG, 1)  # (KKG, 1)

    # ---- weight-branch input: avgpool for stride>1, flatten spatial --------
    if stride > 1:
        xw = x.reshape(B, C, Hout, stride, Wout, stride).mean(axis=(3, 5))
    else:
        xw = x
    xw2 = xw.reshape(B, C, S)                                 # channels x spatial

    # ---- im2col-style tap extraction (handles padding/stride/dilation) -----
    pad = (K + (K - 1) * (dilation - 1) - 1) // 2
    xp = jnp.pad(x, ((0, 0), (0, 0), (pad, pad), (pad, pad)))
    taps = []
    for i in range(K):
        for j in range(K):
            taps.append(xp[:, :,
                           i * dilation: i * dilation + stride * Hout: stride,
                           j * dilation: j * dilation + stride * Wout: stride])
    patches = jnp.stack(taps, axis=1).reshape(B, KK, C, S)

    # ---- spatial tiling: lane-dense (multiple of 128) or full extent --------
    TS = S
    for cand in (2048, 1024, 512):
        if S % cand == 0:
            TS = cand
            break
    n_s = S // TS

    kern = functools.partial(_involution_fused_kernel, K=K, G=G, GC=GC)
    out = pl.pallas_call(
        kern,
        out_shape=jax.ShapeDtypeStruct((B, C, S), jnp.float32),
        grid_spec=pltpu.PrefetchScalarGridSpec(
            num_scalar_prefetch=0,
            grid=(B, n_s),
            in_specs=[
                pl.BlockSpec((None, C, TS), lambda b, s: (b, 0, s)),
                pl.BlockSpec((Cr, C), lambda b, s: (0, 0)),
                pl.BlockSpec((Cr, 1), lambda b, s: (0, 0)),
                pl.BlockSpec((Cr, 1), lambda b, s: (0, 0)),
                pl.BlockSpec((KKG, Cr), lambda b, s: (0, 0)),
                pl.BlockSpec((KKG, 1), lambda b, s: (0, 0)),
                pl.BlockSpec((None, KK, C, TS), lambda b, s: (b, 0, 0, s)),
            ],
            out_specs=pl.BlockSpec((None, C, TS), lambda b, s: (b, 0, s)),
        ),
        compiler_params=pltpu.CompilerParams(
            dimension_semantics=("parallel", "parallel")),
    )(xw2, w1t, s_col, t_col, w2t, b2t, patches)

    return out.reshape(B, C, Hout, Wout)


# ---------------------------------------------------------------------------
# Pure-JAX reference (same semantics as the PyTorch module, eval-mode BN)
# ---------------------------------------------------------------------------
def involution_reference(x, params, *, kernel_size, stride=1, dilation=1,
                         group_channels=16):
    B, C, H, W = x.shape
    K = kernel_size
    G = C // group_channels
    GC = group_channels
    Hout, Wout = H // stride, W // stride
    w1, bn_scale, bn_bias, w2, b2 = params

    xw = (x.reshape(B, C, Hout, stride, Wout, stride).mean(axis=(3, 5))
          if stride > 1 else x)
    x2d = jnp.transpose(xw, (0, 2, 3, 1)).reshape(-1, C)
    h = jnp.maximum(x2d @ w1 * bn_scale + bn_bias, 0.0)
    wvec = h @ w2 + b2
    weight = wvec.reshape(B, Hout, Wout, G, K, K).transpose(0, 3, 4, 5, 1, 2)

    pad = (K + (K - 1) * (dilation - 1) - 1) // 2
    xp = jnp.pad(x, ((0, 0), (0, 0), (pad, pad), (pad, pad)))
    xpg = xp.reshape(B, G, GC, H + 2 * pad, W + 2 * pad)

    out = jnp.zeros((B, G, GC, Hout, Wout), jnp.float32)
    for i in range(K):
        for j in range(K):
            patch = xpg[:, :, :,
                        i * dilation: i * dilation + stride * Hout: stride,
                        j * dilation: j * dilation + stride * Wout: stride]
            out = out + patch * weight[:, :, i, j][:, :, None, :, :]
    return out.reshape(B, C, Hout, Wout)


# ---------------------------------------------------------------------------
if __name__ == "__main__":
    # Channels must be a multiple of group_channels (=16) -> C=16, groups=1;
    # reduction_ratio=4 -> Cr=4.
    B, C, H, W = 2, 16, 16, 16
    K, stride, dilation = 3, 1, 1
    GC = 16
    G = C // GC
    Cr = C // 4
    KKG = K * K * G

    key = jax.random.PRNGKey(0)
    k_x, k_w1, k_g, k_b, k_w2, k_b2 = jax.random.split(key, 6)

    x = jax.random.normal(k_x, (B, C, H, W), jnp.float32)

    # conv1: 1x1 conv (no bias) + BN(eval) + ReLU  -> stored as (C, Cr)
    w1 = jax.random.normal(k_w1, (C, Cr), jnp.float32) * 0.2
    gamma = 1.0 + 0.1 * jax.random.normal(k_g, (Cr,), jnp.float32)
    beta = 0.1 * jax.random.normal(k_b, (Cr,), jnp.float32)
    run_mean = jnp.zeros((Cr,), jnp.float32)
    run_var = jnp.ones((Cr,), jnp.float32)
    eps = 1e-5
    bn_scale = (gamma / jnp.sqrt(run_var + eps)).reshape(1, Cr)
    bn_bias = (beta - run_mean * gamma / jnp.sqrt(run_var + eps)).reshape(1, Cr)

    # conv2: 1x1 conv with bias -> stored as (Cr, K*K*G), (1, K*K*G)
    w2 = jax.random.normal(k_w2, (Cr, KKG), jnp.float32) * 0.2
    b2 = (0.05 * jax.random.normal(k_b2, (KKG,), jnp.float32)).reshape(1, KKG)

    params = (w1, bn_scale, bn_bias, w2, b2)

    out = involution_forward(x, params, kernel_size=K, stride=stride,
                             dilation=dilation, group_channels=GC)
    out = jax.block_until_ready(out)

    ref = involution_reference(x, params, kernel_size=K, stride=stride,
                               dilation=dilation, group_channels=GC)
    ref = jax.block_until_ready(ref)

    assert out.shape == (B, C, H // stride, W // stride)
    np.testing.assert_allclose(np.asarray(out), np.asarray(ref),
                               rtol=1e-4, atol=1e-4)

    # Extra check: exercise the stride=2 / dilation=1 path (avgpool branch +
    # strided tap extraction) against the reference as well.
    out_s2 = involution_forward(x, params, kernel_size=K, stride=2,
                                dilation=dilation, group_channels=GC)
    ref_s2 = involution_reference(x, params, kernel_size=K, stride=2,
                                  dilation=dilation, group_channels=GC)
    np.testing.assert_allclose(np.asarray(jax.block_until_ready(out_s2)),
                               np.asarray(jax.block_until_ready(ref_s2)),
                               rtol=1e-4, atol=1e-4)

    print("KERNEL_OK")
</pallas_src>

<mosaic_0001>
module attributes {stable_mosaic.version = 11 : i64} {
  func.func @_involution_fused_kernel(%arg0: i32, %arg1: i32, %arg2: memref<1x16x256xf32, #tpu.memory_space<vmem>>, %arg3: memref<4x16xf32, #tpu.memory_space<vmem>>, %arg4: memref<4x1xf32, #tpu.memory_space<vmem>>, %arg5: memref<4x1xf32, #tpu.memory_space<vmem>>, %arg6: memref<9x4xf32, #tpu.memory_space<vmem>>, %arg7: memref<9x1xf32, #tpu.memory_space<vmem>>, %arg8: memref<1x9x16x256xf32, #tpu.memory_space<vmem>>, %arg9: memref<1x16x256xf32, #tpu.memory_space<vmem>>) attributes {dimension_semantics = [#tpu.dimension_semantics<parallel>, #tpu.dimension_semantics<parallel>], iteration_bounds = array<i64: 2, 1>, scalar_prefetch = 0 : i64, scratch_operands = 0 : i64, tpu.core_type = #tpu.core_type<tc>, window_params = [{transform_indices = @transform_0, window_bounds = array<i64: 1, 16, 256>}, {pipeline_mode = #tpu.pipeline_mode<synchronous>, transform_indices = @transform_1, window_bounds = array<i64: 4, 16>}, {pipeline_mode = #tpu.pipeline_mode<synchronous>, transform_indices = @transform_2, window_bounds = array<i64: 4, 1>}, {pipeline_mode = #tpu.pipeline_mode<synchronous>, transform_indices = @transform_3, window_bounds = array<i64: 4, 1>}, {pipeline_mode = #tpu.pipeline_mode<synchronous>, transform_indices = @transform_4, window_bounds = array<i64: 9, 4>}, {pipeline_mode = #tpu.pipeline_mode<synchronous>, transform_indices = @transform_5, window_bounds = array<i64: 9, 1>}, {transform_indices = @transform_6, window_bounds = array<i64: 1, 9, 16, 256>}, {transform_indices = @transform_7, window_bounds = array<i64: 1, 16, 256>}]} {
    %c0 = arith.constant 0 : index
    %c0_0 = arith.constant 0 : index
    %0 = vector.load %arg3[%c0, %c0_0] : memref<4x16xf32, #tpu.memory_space<vmem>>, vector<4x16xf32>
    %c0_1 = arith.constant 0 : index
    %c0_2 = arith.constant 0 : index
    %c0_3 = arith.constant 0 : index
    %1 = vector.load %arg2[%c0_1, %c0_2, %c0_3] : memref<1x16x256xf32, #tpu.memory_space<vmem>>, vector<1x16x256xf32>
    %2 = vector.shape_cast %1 : vector<1x16x256xf32> to vector<16x256xf32>
    %cst = arith.constant dense<0.000000e+00> : vector<4x256xf32>
    %3 = tpu.matmul %0, %2, %cst {dimension_numbers = #tpu.dot_dimension_numbers<[1], [0], [0], [1], [0, 0, 1, 1], [], []>} : vector<4x16xf32>, vector<16x256xf32>, vector<4x256xf32> -> vector<4x256xf32>
    %c0_4 = arith.constant 0 : index
    %c0_5 = arith.constant 0 : index
    %4 = vector.load %arg4[%c0_4, %c0_5] : memref<4x1xf32, #tpu.memory_space<vmem>>, vector<4x1xf32>
    %5 = vector.broadcast %4 : vector<4x1xf32> to vector<4x256xf32>
    %6 = arith.mulf %3, %5 : vector<4x256xf32>
    %c0_6 = arith.constant 0 : index
    %c0_7 = arith.constant 0 : index
    %7 = vector.load %arg5[%c0_6, %c0_7] : memref<4x1xf32, #tpu.memory_space<vmem>>, vector<4x1xf32>
    %8 = vector.broadcast %7 : vector<4x1xf32> to vector<4x256xf32>
    %9 = arith.addf %6, %8 : vector<4x256xf32>
    %cst_8 = arith.constant 0.000000e+00 : f32
    %10 = vector.broadcast %cst_8 : f32 to vector<4x256xf32>
    %11 = arith.maximumf %9, %10 : vector<4x256xf32>
    %c0_9 = arith.constant 0 : index
    %c0_10 = arith.constant 0 : index
    %12 = vector.load %arg6[%c0_9, %c0_10] : memref<9x4xf32, #tpu.memory_space<vmem>>, vector<9x4xf32>
    %cst_11 = arith.constant dense<0.000000e+00> : vector<9x256xf32>
    %13 = tpu.matmul %12, %11, %cst_11 {dimension_numbers = #tpu.dot_dimension_numbers<[1], [0], [0], [1], [0, 0, 1, 1], [], []>} : vector<9x4xf32>, vector<4x256xf32>, vector<9x256xf32> -> vector<9x256xf32>
    %c0_12 = arith.constant 0 : index
    %c0_13 = arith.constant 0 : index
    %14 = vector.load %arg7[%c0_12, %c0_13] : memref<9x1xf32, #tpu.memory_space<vmem>>, vector<9x1xf32>
    %15 = vector.broadcast %14 : vector<9x1xf32> to vector<9x256xf32>
    %16 = arith.addf %13, %15 : vector<9x256xf32>
    %17 = vector.shape_cast %16 : vector<9x256xf32> to vector<9x1x1x256xf32>
    %cst_14 = arith.constant 0.000000e+00 : f32
    %18 = vector.broadcast %cst_14 : f32 to vector<1x16x256xf32>
    %c0_15 = arith.constant 0 : index
    %c0_16 = arith.constant 0 : index
    %c0_17 = arith.constant 0 : index
    %c0_18 = arith.constant 0 : index
    %19 = vector.load %arg8[%c0_15, %c0_16, %c0_17, %c0_18] : memref<1x9x16x256xf32, #tpu.memory_space<vmem>>, vector<1x1x16x256xf32>
    %20 = vector.shape_cast %19 : vector<1x1x16x256xf32> to vector<16x256xf32>
    %21 = vector.shape_cast %20 : vector<16x256xf32> to vector<1x16x256xf32>
    %22 = vector.extract_strided_slice %17 {offsets = [0, 0, 0, 0], sizes = [1, 1, 1, 256], strides = [1, 1, 1, 1]} : vector<9x1x1x256xf32> to vector<1x1x1x256xf32>
    %23 = vector.shape_cast %22 : vector<1x1x1x256xf32> to vector<1x1x256xf32>
    %24 = vector.broadcast %23 : vector<1x1x256xf32> to vector<1x16x256xf32>
    %25 = arith.mulf %21, %24 : vector<1x16x256xf32>
    %26 = arith.addf %18, %25 : vector<1x16x256xf32>
    %c0_19 = arith.constant 0 : index
    %c1 = arith.constant 1 : index
    %c0_20 = arith.constant 0 : index
    %c0_21 = arith.constant 0 : index
    %27 = vector.load %arg8[%c0_19, %c1, %c0_20, %c0_21] : memref<1x9x16x256xf32, #tpu.memory_space<vmem>>, vector<1x1x16x256xf32>
    %28 = vector.shape_cast %27 : vector<1x1x16x256xf32> to vector<16x256xf32>
    %29 = vector.shape_cast %28 : vector<16x256xf32> to vector<1x16x256xf32>
    %30 = vector.extract_strided_slice %17 {offsets = [1, 0, 0, 0], sizes = [1, 1, 1, 256], strides = [1, 1, 1, 1]} : vector<9x1x1x256xf32> to vector<1x1x1x256xf32>
    %31 = vector.shape_cast %30 : vector<1x1x1x256xf32> to vector<1x1x256xf32>
    %32 = vector.broadcast %31 : vector<1x1x256xf32> to vector<1x16x256xf32>
    %33 = arith.mulf %29, %32 : vector<1x16x256xf32>
    %34 = arith.addf %26, %33 : vector<1x16x256xf32>
    %c0_22 = arith.constant 0 : index
    %c2 = arith.constant 2 : index
    %c0_23 = arith.constant 0 : index
    %c0_24 = arith.constant 0 : index
    %35 = vector.load %arg8[%c0_22, %c2, %c0_23, %c0_24] : memref<1x9x16x256xf32, #tpu.memory_space<vmem>>, vector<1x1x16x256xf32>
    %36 = vector.shape_cast %35 : vector<1x1x16x256xf32> to vector<16x256xf32>
    %37 = vector.shape_cast %36 : vector<16x256xf32> to vector<1x16x256xf32>
    %38 = vector.extract_strided_slice %17 {offsets = [2, 0, 0, 0], sizes = [1, 1, 1, 256], strides = [1, 1, 1, 1]} : vector<9x1x1x256xf32> to vector<1x1x1x256xf32>
    %39 = vector.shape_cast %38 : vector<1x1x1x256xf32> to vector<1x1x256xf32>
    %40 = vector.broadcast %39 : vector<1x1x256xf32> to vector<1x16x256xf32>
    %41 = arith.mulf %37, %40 : vector<1x16x256xf32>
    %42 = arith.addf %34, %41 : vector<1x16x256xf32>
    %c0_25 = arith.constant 0 : index
    %c3 = arith.constant 3 : index
    %c0_26 = arith.constant 0 : index
    %c0_27 = arith.constant 0 : index
    %43 = vector.load %arg8[%c0_25, %c3, %c0_26, %c0_27] : memref<1x9x16x256xf32, #tpu.memory_space<vmem>>, vector<1x1x16x256xf32>
    %44 = vector.shape_cast %43 : vector<1x1x16x256xf32> to vector<16x256xf32>
    %45 = vector.shape_cast %44 : vector<16x256xf32> to vector<1x16x256xf32>
    %46 = vector.extract_strided_slice %17 {offsets = [3, 0, 0, 0], sizes = [1, 1, 1, 256], strides = [1, 1, 1, 1]} : vector<9x1x1x256xf32> to vector<1x1x1x256xf32>
    %47 = vector.shape_cast %46 : vector<1x1x1x256xf32> to vector<1x1x256xf32>
    %48 = vector.broadcast %47 : vector<1x1x256xf32> to vector<1x16x256xf32>
    %49 = arith.mulf %45, %48 : vector<1x16x256xf32>
    %50 = arith.addf %42, %49 : vector<1x16x256xf32>
    %c0_28 = arith.constant 0 : index
    %c4 = arith.constant 4 : index
    %c0_29 = arith.constant 0 : index
    %c0_30 = arith.constant 0 : index
    %51 = vector.load %arg8[%c0_28, %c4, %c0_29, %c0_30] : memref<1x9x16x256xf32, #tpu.memory_space<vmem>>, vector<1x1x16x256xf32>
    %52 = vector.shape_cast %51 : vector<1x1x16x256xf32> to vector<16x256xf32>
    %53 = vector.shape_cast %52 : vector<16x256xf32> to vector<1x16x256xf32>
    %54 = vector.extract_strided_slice %17 {offsets = [4, 0, 0, 0], sizes = [1, 1, 1, 256], strides = [1, 1, 1, 1]} : vector<9x1x1x256xf32> to vector<1x1x1x256xf32>
    %55 = vector.shape_cast %54 : vector<1x1x1x256xf32> to vector<1x1x256xf32>
    %56 = vector.broadcast %55 : vector<1x1x256xf32> to vector<1x16x256xf32>
    %57 = arith.mulf %53, %56 : vector<1x16x256xf32>
    %58 = arith.addf %50, %57 : vector<1x16x256xf32>
    %c0_31 = arith.constant 0 : index
    %c5 = arith.constant 5 : index
    %c0_32 = arith.constant 0 : index
    %c0_33 = arith.constant 0 : index
    %59 = vector.load %arg8[%c0_31, %c5, %c0_32, %c0_33] : memref<1x9x16x256xf32, #tpu.memory_space<vmem>>, vector<1x1x16x256xf32>
    %60 = vector.shape_cast %59 : vector<1x1x16x256xf32> to vector<16x256xf32>
    %61 = vector.shape_cast %60 : vector<16x256xf32> to vector<1x16x256xf32>
    %62 = vector.extract_strided_slice %17 {offsets = [5, 0, 0, 0], sizes = [1, 1, 1, 256], strides = [1, 1, 1, 1]} : vector<9x1x1x256xf32> to vector<1x1x1x256xf32>
    %63 = vector.shape_cast %62 : vector<1x1x1x256xf32> to vector<1x1x256xf32>
    %64 = vector.broadcast %63 : vector<1x1x256xf32> to vector<1x16x256xf32>
    %65 = arith.mulf %61, %64 : vector<1x16x256xf32>
    %66 = arith.addf %58, %65 : vector<1x16x256xf32>
    %c0_34 = arith.constant 0 : index
    %c6 = arith.constant 6 : index
    %c0_35 = arith.constant 0 : index
    %c0_36 = arith.constant 0 : index
    %67 = vector.load %arg8[%c0_34, %c6, %c0_35, %c0_36] : memref<1x9x16x256xf32, #tpu.memory_space<vmem>>, vector<1x1x16x256xf32>
    %68 = vector.shape_cast %67 : vector<1x1x16x256xf32> to vector<16x256xf32>
    %69 = vector.shape_cast %68 : vector<16x256xf32> to vector<1x16x256xf32>
    %70 = vector.extract_strided_slice %17 {offsets = [6, 0, 0, 0], sizes = [1, 1, 1, 256], strides = [1, 1, 1, 1]} : vector<9x1x1x256xf32> to vector<1x1x1x256xf32>
    %71 = vector.shape_cast %70 : vector<1x1x1x256xf32> to vector<1x1x256xf32>
    %72 = vector.broadcast %71 : vector<1x1x256xf32> to vector<1x16x256xf32>
    %73 = arith.mulf %69, %72 : vector<1x16x256xf32>
    %74 = arith.addf %66, %73 : vector<1x16x256xf32>
    %c0_37 = arith.constant 0 : index
    %c7 = arith.constant 7 : index
    %c0_38 = arith.constant 0 : index
    %c0_39 = arith.constant 0 : index
    %75 = vector.load %arg8[%c0_37, %c7, %c0_38, %c0_39] : memref<1x9x16x256xf32, #tpu.memory_space<vmem>>, vector<1x1x16x256xf32>
    %76 = vector.shape_cast %75 : vector<1x1x16x256xf32> to vector<16x256xf32>
    %77 = vector.shape_cast %76 : vector<16x256xf32> to vector<1x16x256xf32>
    %78 = vector.extract_strided_slice %17 {offsets = [7, 0, 0, 0], sizes = [1, 1, 1, 256], strides = [1, 1, 1, 1]} : vector<9x1x1x256xf32> to vector<1x1x1x256xf32>
    %79 = vector.shape_cast %78 : vector<1x1x1x256xf32> to vector<1x1x256xf32>
    %80 = vector.broadcast %79 : vector<1x1x256xf32> to vector<1x16x256xf32>
    %81 = arith.mulf %77, %80 : vector<1x16x256xf32>
    %82 = arith.addf %74, %81 : vector<1x16x256xf32>
    %c0_40 = arith.constant 0 : index
    %c8 = arith.constant 8 : index
    %c0_41 = arith.constant 0 : index
    %c0_42 = arith.constant 0 : index
    %83 = vector.load %arg8[%c0_40, %c8, %c0_41, %c0_42] : memref<1x9x16x256xf32, #tpu.memory_space<vmem>>, vector<1x1x16x256xf32>
    %84 = vector.shape_cast %83 : vector<1x1x16x256xf32> to vector<16x256xf32>
    %85 = vector.shape_cast %84 : vector<16x256xf32> to vector<1x16x256xf32>
    %86 = vector.extract_strided_slice %17 {offsets = [8, 0, 0, 0], sizes = [1, 1, 1, 256], strides = [1, 1, 1, 1]} : vector<9x1x1x256xf32> to vector<1x1x1x256xf32>
    %87 = vector.shape_cast %86 : vector<1x1x1x256xf32> to vector<1x1x256xf32>
    %88 = vector.broadcast %87 : vector<1x1x256xf32> to vector<1x16x256xf32>
    %89 = arith.mulf %85, %88 : vector<1x16x256xf32>
    %90 = arith.addf %82, %89 : vector<1x16x256xf32>
    %91 = vector.shape_cast %90 : vector<1x16x256xf32> to vector<16x256xf32>
    %c0_43 = arith.constant 0 : index
    %c0_44 = arith.constant 0 : index
    %c0_45 = arith.constant 0 : index
    %92 = vector.load %arg9[%c0_43, %c0_44, %c0_45] : memref<1x16x256xf32, #tpu.memory_space<vmem>>, vector<1x16x256xf32>
    %93 = vector.shape_cast %92 : vector<1x16x256xf32> to vector<16x256xf32>
    %94 = vector.shape_cast %91 : vector<16x256xf32> to vector<1x16x256xf32>
    tpu.vector_store %arg9[%c0_43, %c0_44, %c0_45], %94 {strides = array<i32>} : memref<1x16x256xf32, #tpu.memory_space<vmem>>, vector<1x16x256xf32>,
    return
  }
  func.func @transform_0(%arg0: i32, %arg1: i32) -> (i32, i32, i32) {
    %c0_i32 = arith.constant 0 : i32
    %c0_i32_0 = arith.constant 0 : i32
    return %arg0, %c0_i32, %arg1 : i32, i32, i32
  }
  func.func @transform_1(%arg0: i32, %arg1: i32) -> (i32, i32) {
    %c0_i32 = arith.constant 0 : i32
    %c0_i32_0 = arith.constant 0 : i32
    %c0_i32_1 = arith.constant 0 : i32
    return %c0_i32, %c0_i32_0 : i32, i32
  }
  func.func @transform_2(%arg0: i32, %arg1: i32) -> (i32, i32) {
    %c0_i32 = arith.constant 0 : i32
    %c0_i32_0 = arith.constant 0 : i32
    %c0_i32_1 = arith.constant 0 : i32
    return %c0_i32, %c0_i32_0 : i32, i32
  }
  func.func @transform_3(%arg0: i32, %arg1: i32) -> (i32, i32) {
    %c0_i32 = arith.constant 0 : i32
    %c0_i32_0 = arith.constant 0 : i32
    %c0_i32_1 = arith.constant 0 : i32
    return %c0_i32, %c0_i32_0 : i32, i32
  }
  func.func @transform_4(%arg0: i32, %arg1: i32) -> (i32, i32) {
    %c0_i32 = arith.constant 0 : i32
    %c0_i32_0 = arith.constant 0 : i32
    %c0_i32_1 = arith.constant 0 : i32
    return %c0_i32, %c0_i32_0 : i32, i32
  }
  func.func @transform_5(%arg0: i32, %arg1: i32) -> (i32, i32) {
    %c0_i32 = arith.constant 0 : i32
    %c0_i32_0 = arith.constant 0 : i32
    %c0_i32_1 = arith.constant 0 : i32
    return %c0_i32, %c0_i32_0 : i32, i32
  }
  func.func @transform_6(%arg0: i32, %arg1: i32) -> (i32, i32, i32, i32) {
    %c0_i32 = arith.constant 0 : i32
    %c0_i32_0 = arith.constant 0 : i32
    %c0_i32_1 = arith.constant 0 : i32
    return %arg0, %c0_i32, %c0_i32_0, %arg1 : i32, i32, i32, i32
  }
  func.func @transform_7(%arg0: i32, %arg1: i32) -> (i32, i32, i32) {
    %c0_i32 = arith.constant 0 : i32
    %c0_i32_0 = arith.constant 0 : i32
    return %arg0, %c0_i32, %arg1 : i32, i32, i32
  }
}

</mosaic_0001>

<bundles_post_ra>
// kernel: tpu_custom_call.1
= control target key start
LH: loop header
LB: loop body
LE: loop exit
PB: predicated region body
PF: predicated region fallthrough
CT: control target
= control target key end

     0   :  { %s1334_s0 = inlined_call_operand.hbm [shape: f32[2,16,256], index: 0, kind: input, shape index: {}]   ;;  %s1335_s1 = inlined_call_operand.vmem [shape: f32[4,16], index: 1, kind: input, shape index: {}]   ;;  %s1336_s2 = inlined_call_operand.vmem [shape: f32[4,1], index: 2, kind: input, shape index: {}]   ;;  %s1337_s3 = inlined_call_operand.vmem [shape: f32[4,1], index: 3, kind: input, shape index: {}]   ;;  %s1338_s4 = inlined_call_operand.vmem [shape: f32[9,4], index: 4, kind: input, shape index: {}]   ;;  %s1339_s5 = inlined_call_operand.vmem [shape: f32[9,1], index: 5, kind: input, shape index: {}]   ;;  %s1340_s6 = inlined_call_operand.hbm [shape: f32[2,9,16,256], index: 6, kind: input, shape index: {}]   ;;  %s1341_s7 = inlined_call_operand.hbm [shape: f32[2,16,256], index: 7, kind: output, shape index: {}]  }
   0x1   :  { %1344 = sst [smem:[#allocation14_spill]] %s1334_s0 }
   0x2   :  { %12 = vsyncpa [#allocation3], 0 }
   0x3   :  { %14 = vsyncpa [#allocation3 + $0x1], 0 }
   0x4   :  { %15 = vsyncpa [#allocation6], 0 }
   0x5   :  { %17 = vsyncpa [#allocation6 + $0x1], 0 }
   0x6   :  { %18 = vsyncpa [#allocation4], 0 }
   0x7   :  { %20 = vsyncpa [#allocation4 + $0x1], 0  ;;  %s1104_s24 = smov 0   ;;  %s1106_s25 = smov 0  }
   0x8   :  { %s1108_s26 = smov 0   ;;  %s1110_s27 = smov 0  }
   0x9   :  { %s1112_s28 = smov 0   ;;  %s1114_s29 = smov 0  }
   0xa LB: > { %1345 = sst [smem:[#allocation11_spill]] %s1045_s26  ;;  %s776_s30 = sadd.s32 4294967295, %s1057_s29   ;;  %s1057_s29 = sphi %s1114_s29, %s26_s29   ;;  %s1053_s28 = sphi %s1112_s28, %s1360_s28   ;;  %s1049_s27 = sphi %s1110_s27, %s1359_s27   ;;  %s1045_s26 = sphi %s1108_s26, %s1355_s26   ;;  %s1041_s25 = sphi %s1106_s25, %s1358_s25   ;;  %s1037_s24 = sphi %s1104_s24, %s1357_s24  }
   0xb   : > { %s777_s8 = sadd.s32 4294967294, %s1057_s29   ;;  %s38_s9 = sadd.s32 1, %s1053_s28 }
   0xc   : > { %s47_s10 = sadd.s32 1, %s1045_s26  ;;  %p40_p0 = scmp.ge.s32.totalorder %s38_s9, 2 }
   0xd   : > { %p54_p1 = scmp.ne.s32.totalorder %s1045_s26, %s1041_s25  ;;  %p55_p2 = scmp.eq.s32.totalorder %s1057_s29, 0 }
   0xe   : > { %p60_p3 = scmp.ne.s32.totalorder %s1041_s25, %s1037_s24  ;;  %s1362_s9 = smov (%p40_p0, %s38_s9), 0 }
   0xf   : > { %1346 = sst [smem:[#allocation12_spill]] %s1362_s9  ;;  %p1145_p4 = por %p55_p2, %p54_p1 }
  0x10   : > { %p61_p5 = scmp.eq.s32.totalorder %s776_s30, 0  ;;  %s42_s12 = ssub.s32 %s1053_s28, %s1362_s9 }
  0x11   : > { %p219_p6 = scmp.eq.s32.totalorder %s776_s30, 1  ;;  %p45_p7 = scmp.eq.s32.totalorder %s42_s12, 0 }
  0x12   : > { %p1151_p8 = por %p61_p5, %p60_p3  ;;  %p225_p10 = scmp.eq.s32.totalorder %s777_s8, 1 }
  0x13   : > { %p1155_p9 = por %p219_p6, %p54_p1  ;;  %p779_p12 = scmp.ge.s32.totalorder %s1057_s29, 2 }
  0x14   : > { %s1160_s15 = scalar_select %p45_p7, %s1045_s26, %s47_s10  }
  0x15   : > { %p1162_p11 = por %p225_p10, %p60_p3  ;;  %p854_p13 = scmp.lt.s32.totalorder %s1057_s29, 2 }
  0x16   : > { %1350 = sst [smem:[#allocation13_spill]] %s1160_s15  ;;  %s1169_s17 = sand.u32 1, %s1045_s26  }
  0x17   : > { %s780_s18 = sshll.u32 %s1169_s17, 5  ;;  %s832_s19 = sshll.u32 %s1053_s28, 5 }
  0x18   : > { %s1352_s0 = sld [smem:[#allocation14_spill]]  ;;  %s264_s23 = scalar_lea.vmem [#allocation2], %s780_s18 }
  0x19   : > { %s274_s30 = sshll.u32 %s264_s23, 4  ;;  %p1178_p0 = pnand %p854_p13, %p1145_p4  ;;  %s275_s30 = int_to_ptr.vmem [resolvable:$true] %s274_s30 }
  0x1a   : > { %p784_p1 = scmp.ge.s32.totalorder %s1057_s29, 1  ;;  %s261_s12 = scalar_lea.sflag [#allocation3], %s1169_s17 }
  0x1b   : > { %s1059_s9 = smov 256   ;;  %s1060_s15 = smov 16  }
  0x1c   : > { %p306_p2 = scmp.lt.s32.totalorder %s1057_s29, 3  ;;  %s834_s18 = smul.u32 288, %s1169_s17 }
  0x1d   : > { %s285_s26 = scalar_lea.sflag [#allocation6], %s1169_s17 }
  0x1e   : > { %s271_s22 = scalar_lea.hbm %s1352_s0, %s832_s19  ;;  %p307_p3 = pnand %p784_p1, %p306_p2 }
  0x1f   : > { %s272_s8 = sshll.u32 %s271_s22, 4  ;;  %s835_s19 = smul.u32 288, %s1053_s28  ;;  %s273_s8 = int_to_ptr.hbm [resolvable:$true] %s272_s8 }
  0x20   : > { %846 = dma.hbm_to_vmem [thread:$0]  (!%p1178_p0), %s273_s8, 512, %s275_s30, %s261_s12, %s1059_s9, %s1059_s9, %s1060_s15  }
  0x21   : > { %s295_s11 = scalar_lea.hbm %s1340_s6, %s835_s19  ;;  %s288_s22 = scalar_lea.vmem [#allocation5], %s834_s18 }
  0x22   : > { %s298_s23 = sshll.u32 %s288_s22, 4  ;;  %s296_s0 = sshll.u32 %s295_s11, 4  ;;  %s299_s23 = int_to_ptr.vmem [resolvable:$true] %s298_s23  ;;  %s297_s0 = int_to_ptr.hbm [resolvable:$true] %s296_s0 }
  0x23   : > { %849 = dma.hbm_to_vmem [thread:$0]  (!%p1178_p0), %s297_s0, 4608, %s299_s23, %s285_s26, %s1059_s9, %s1059_s9, %s1060_s15  }
  0x24   : > { %310 = sbr.rel (%p307_p3) target bundleno = 350 (0x15e), region = 48  ;;  %s1196_s30 = sand.u32 (!%p307_p3), 1, %s1041_s25  }
  0x25   : > { %s785_s8 = sshll.u32 (!%p307_p3), %s1196_s30, 5  ;;  %s313_s12 = scalar_lea.sflag (!%p307_p3), [#allocation3], %s1196_s30 }
  0x26   : > { %s316_s19 = scalar_lea.vmem (!%p307_p3), [#allocation2], %s785_s8 }
  0x29   : > { %1024 = dma.done.wait (%p1151_p8), %s313_s12, 512  }
  0x2a   : > { %1026 = vsyncadd (%p1151_p8), %s313_s12, 4294966784  ;;  %s836_s0 = smul.u32 288, %s1196_s30  ;;  %s323_s26 = scalar_lea.sflag [#allocation6], %s1196_s30 }
  0x2c   : > { %s1208_s9 = scalar_lea.vmem [#allocation5], %s836_s0 }
  0x2d   : > { %1028 = dma.done.wait (%p1151_p8), %s323_s26, 4608  }
  0x2e   : > { %1030 = vsyncadd (%p1151_p8), %s323_s26, 4294962688  ;;  %v1061_v0 = vmov 0   ;;  %v415_v1 = vld [vmem:[%s1336_s2] sm:$0xf]  ;;  %v369_v2 = vld [vmem:[%s316_s19 + $0x10] sm:$0xff]  ;;  %vm371_vm0 = vcmask 130048  }
  0x2f   : > { %909 = vset.pattern.permute.xlu0 %v1061_v0  ;;  %910 = vset.pattern.permute.xlu1 %v1061_v0  ;;  %v370_v3 = vld [vmem:[%s316_s19 + $0x18] sm:$0xff]  ;;  %v367_v4 = vld [vmem:[%s316_s19] sm:$0xff]  ;;  %v368_v5 = vld [vmem:[%s316_s19 + $0x8] sm:$0xff]  ;;  %vm454_vm1 = vcmask 1043456   ;;  %vm447_vm2 = vcmask 31744   ;;  %s833_s15 = sshll.u32 %s1049_s27, 5 }
  0x30   : > { %418 = vperm.xlu0 %909, %v415_v1   ;;  %389 = vmatpush.msra.mxu0 %v369_v2  ;;  %v366_v6 = vld [vmem:[%s1335_s1] sm:$0xf]  ;;  %v436_v9 = vld [vmem:[%s1339_s5 + $0x8] sm:$0x1]  ;;  %v509_v27 = vld [vmem:[%s1208_s9 + $0x10] sm:$0xff]  ;;  %s362_s17 = scalar_lea.vmem [#allocation7], %s785_s8  ;;  %s659_s13 = scalar_lea.hbm %s1341_s7, %s833_s15 }
  0x31   : > { %409 = vmatpush.msra.mxu1 %v370_v3  ;;  %v423_v7 = vld [vmem:[%s1337_s3] sm:$0xf]  ;;  %v434_v21 = vld [vmem:[%s1338_s4 + $0x8] sm:$0x1]  ;;  %v797_v29 = vld [vmem:[%s1208_s9 + $0x30] sm:$0xff]  ;;  %s660_s20 = sshll.u32 %s362_s17, 4  ;;  %s661_s20 = int_to_ptr.vmem [resolvable:$true] %s660_s20 }
  0x32   : > { %390 = vmatpush.msra.mxu0 %v367_v4  ;;  %v435_v8 = vld [vmem:[%s1339_s5] sm:$0xff]  ;;  %v801_v33 = vld [vmem:[%s1208_s9 + $0x50] sm:$0xff]  ;;  %v508_v2 = vld [vmem:[%s1208_s9 + $0x8] sm:$0xff]  ;;  %s662_s27 = sshll.u32 %s659_s13, 4  ;;  %s646_s8 = scalar_lea.sflag [#allocation4], %s1196_s30  ;;  %s663_s27 = int_to_ptr.hbm [resolvable:$true] %s662_s27 }
  0x33   : > { %410 = vmatpush.msra.mxu1 %v368_v5  ;;  %787 = vmatmul.msk.f32.vlgmr.msra.gmra.mxu0 %vm371_vm0, %v366_v6  ;;  %v433_v19 = vld [vmem:[%s1338_s4] sm:$0xff]  ;;  %v805_v37 = vld [vmem:[%s1208_s9 + $0x70] sm:$0xff]  ;;  %s991_s23 = scalar_lea.hbm %s1341_s7, 64 }
  0x34   : > { %788 = vmatmul.msk.f32.vlgmr.msra.gmra.mxu1 %vm371_vm0, %v366_v6  ;;  %439 = vperm.xlu1 %910, %v435_v8   ;;  %v507_v26 = vld [vmem:[%s1208_s9] sm:$0xff]  ;;  %v809_v46 = vld [vmem:[%s1208_s9 + $0x90] sm:$0xff]  ;;  %v796_v8 = vld [vmem:[%s1208_s9 + $0x28] sm:$0xff] }
  0x35   : > { %v795_v28 = vld [vmem:[%s1208_s9 + $0x20] sm:$0xff]  ;;  %v813_v48 = vld [vmem:[%s1208_s9 + $0xb0] sm:$0xff] }
  0x36   : > { %v799_v32 = vld [vmem:[%s1208_s9 + $0x40] sm:$0xff]  ;;  %v817_v58 = vld [vmem:[%s1208_s9 + $0xd0] sm:$0xff] }
  0x37   : > { %v803_v36 = vld [vmem:[%s1208_s9 + $0x60] sm:$0xff] }
  0x38   : > { %426 = vperm.xlu0 %909, %v423_v7   ;;  %v807_v38 = vld [vmem:[%s1208_s9 + $0x80] sm:$0xff]  ;;  %v510_v7 = vld [vmem:[%s1208_s9 + $0x18] sm:$0xff] }
  0x39   : > { %v811_v47 = vld [vmem:[%s1208_s9 + $0xa0] sm:$0xff] }
  0x3a   : > { %v815_v52 = vld [vmem:[%s1208_s9 + $0xc0] sm:$0xff] }
  0x3b   : > { %v819_v59 = vld [vmem:[%s1208_s9 + $0xe0] sm:$0xff] }
  0x3c   : > { %444 = vperm.xlu1 %910, %v436_v9   ;;  %v798_v9 = vld [vmem:[%s1208_s9 + $0x38] sm:$0xff] }
  0xa2   : > { %v419_v10 = vpop.permute.xlu0 %418 }
  0xa6   : > { %v440_v22 = vpop.permute.xlu1 %439 }
  0xaa   : > { %v427_v14 = vpop.permute.xlu0 %426 }
  0xae   : > { %v445_v60 = vpop.permute.xlu1 %444 }
  0xb0   : > { %v392_v11 = vpop.f32.mrf.mxu0 }
  0xb1   : > { %v421_v12 = vmul.f32 %v419_v10, %v392_v11  ;;  %v412_v13 = vpop.f32.mrf.mxu1  ;;  %v821_v11 = vld [vmem:[%s1208_s9 + $0xf0] sm:$0xff] }
  0xb2   : > { %v422_v15 = vmul.f32 %v419_v10, %v412_v13 }
  0xb3   : > { %v429_v16 = vadd.f32 %v427_v14, %v421_v12 }
  0xb4   : > { %v430_v17 = vadd.f32 %v427_v14, %v422_v15 }
  0xb5   : > { %v431_v18 = vmax.f32 %v429_v16, 0.0 }
  0xb6   : > { %v432_v20 = vmax.f32 %v430_v17, 0.0 }
  0xb7   : > { %789 = vmatpush.msk.msra.mxu2 %vm454_vm1, %v431_v18 }
  0xb8   : > { %792 = vmatpush.msk.msra.mxu3 %vm454_vm1, %v432_v20  ;;  %790 = vmatmul.msk.f32.vlgmr.msra.gmra.mxu2 %vm447_vm2, %v433_v19  ;;  %v802_v20 = vld [vmem:[%s1208_s9 + $0x58] sm:$0xff] }
  0xb9   : > { %793 = vmatmul.msk.f32.vlgmr.msra.gmra.mxu3 %vm447_vm2, %v433_v19  ;;  %v800_v19 = vld [vmem:[%s1208_s9 + $0x48] sm:$0xff] }
  0xc0   : > { %791 = vmatmul.msk.f32.gmra.mxu2 %vm447_vm2, %v434_v21 }
  0xc1   : > { %794 = vmatmul.msk.f32.gmra.mxu3 %vm447_vm2, %v434_v21 }
 0x13b   : > { %v478_v23 = vpop.f32.mrf.mxu2 }
 0x13c   : > { %v1235_v24 = vadd.f32 %v478_v23, %v440_v22  ;;  %v501_v25 = vpop.f32.mrf.mxu3 }
 0x13d   : > { %v1256_v49 = vadd.f32 %v501_v25, %v440_v22 }
 0x13e   : > { %v511_v30 = vperm.slane %v1235_v24, 0  ;;  %v526_v31 = vperm.slane %v1235_v24, 1  ;;  %v541_v34 = vperm.slane %v1235_v24, 2  ;;  %v556_v35 = vperm.slane %v1235_v24, 3 }
 0x13f   : > { %v571_v39 = vperm.slane %v1235_v24, 4  ;;  %v586_v40 = vperm.slane %v1235_v24, 5  ;;  %v601_v41 = vperm.slane %v1235_v24, 6  ;;  %v616_v53 = vperm.slane %v1235_v24, 7 }
 0x140   : > { %v513_v42 = vmul.f32 %v511_v30, %v507_v26  ;;  %v515_v43 = vmul.f32 %v511_v30, %v509_v27  ;;  %v528_v44 = vmul.f32 %v795_v28, %v526_v31  ;;  %v530_v45 = vmul.f32 %v797_v29, %v526_v31  ;;  %v823_v29 = vld [vmem:[%s1208_s9 + $0x100] sm:$0xff] }
 0x141   : > { %v543_v50 = vmul.f32 %v799_v32, %v541_v34  ;;  %v545_v51 = vmul.f32 %v801_v33, %v541_v34  ;;  %v558_v56 = vmul.f32 %v803_v36, %v556_v35  ;;  %v560_v57 = vmul.f32 %v805_v37, %v556_v35  ;;  %v804_v35 = vld [vmem:[%s1208_s9 + $0x68] sm:$0xff]  ;;  %v806_v36 = vld [vmem:[%s1208_s9 + $0x78] sm:$0xff] }
 0x142   : > { %v532_v54 = vadd.f32 %v528_v44, %v513_v42  ;;  %v534_v55 = vadd.f32 %v530_v45, %v515_v43  ;;  %v573_v62 = vmul.f32 %v807_v38, %v571_v39  ;;  %v575_v63 = vmul.f32 %v809_v46, %v571_v39  ;;  %v825_v39 = vld [vmem:[%s1208_s9 + $0x110] sm:$0xff]  ;;  %v810_v42 = vld [vmem:[%s1208_s9 + $0x98] sm:$0xff] }
 0x143   : > { %v481_v61 = vpop.f32.mrf.mxu2  ;;  %v588_v0 = vmul.f32 %v811_v47, %v586_v40  ;;  %v590_v1 = vmul.f32 %v813_v48, %v586_v40  ;;  %v603_v6 = vmul.f32 %v815_v52, %v601_v41  ;;  %v605_v10 = vmul.f32 %v817_v58, %v601_v41  ;;  %v808_v41 = vld [vmem:[%s1208_s9 + $0x88] sm:$0xff] }
 0x144   : > { %v482_v3 = vadd.f32 %v481_v61, %v445_v60  ;;  %v547_v4 = vadd.f32 %v543_v50, %v532_v54  ;;  %v549_v5 = vadd.f32 %v545_v51, %v534_v55  ;;  %v618_v12 = vmul.f32 %v819_v59, %v616_v53  ;;  %v504_v13 = vpop.f32.mrf.mxu3  ;;  %v814_v54 = vld [vmem:[%s1208_s9 + $0xb8] sm:$0xff] }
 0x145   : > { %v512_v14 = vperm.slane %v1256_v49, 0  ;;  %v527_v15 = vperm.slane %v1256_v49, 1  ;;  %v542_v21 = vperm.slane %v1256_v49, 2  ;;  %v620_v28 = vmul.f32 %v821_v11, %v616_v53  ;;  %v812_v53 = vld [vmem:[%s1208_s9 + $0xa8] sm:$0xff] }
 0x146   : > { %v562_v16 = vadd.f32 %v558_v56, %v547_v4  ;;  %v564_v17 = vadd.f32 %v560_v57, %v549_v5  ;;  %v631_v18 = vperm.slane %v482_v3, 0  ;;  %v1273_v30 = vadd.f32 %v504_v13, %v445_v60 }
 0x147   : > { %v514_v22 = vmul.f32 %v512_v14, %v508_v2  ;;  %v516_v23 = vmul.f32 %v512_v14, %v510_v7  ;;  %v529_v24 = vmul.f32 %v796_v8, %v527_v15  ;;  %v531_v25 = vmul.f32 %v798_v9, %v527_v15  ;;  %v818_v2 = vld [vmem:[%s1208_s9 + $0xd8] sm:$0xff]  ;;  %v820_v9 = vld [vmem:[%s1208_s9 + $0xe8] sm:$0xff] }
 0x148   : > { %v577_v26 = vadd.f32 %v573_v62, %v562_v16  ;;  %v579_v27 = vadd.f32 %v575_v63, %v564_v17  ;;  %v544_v33 = vmul.f32 %v800_v19, %v542_v21  ;;  %v546_v34 = vmul.f32 %v802_v20, %v542_v21  ;;  %v816_v63 = vld [vmem:[%s1208_s9 + $0xc8] sm:$0xff]  ;;  %v826_v15 = vld [vmem:[%s1208_s9 + $0x118] sm:$0xff] }
 0x149   : > { %v533_v31 = vadd.f32 %v529_v24, %v514_v22  ;;  %v535_v32 = vadd.f32 %v531_v25, %v516_v23  ;;  %v557_v40 = vperm.slane %v1256_v49, 3  ;;  %v572_v43 = vperm.slane %v1256_v49, 4 }
 0x14a   : > { %v592_v37 = vadd.f32 %v588_v0, %v577_v26  ;;  %v594_v38 = vadd.f32 %v590_v1, %v579_v27  ;;  %v633_v44 = vmul.f32 %v823_v29, %v631_v18  ;;  %v587_v47 = vperm.slane %v1256_v49, 5 }
 0x14b   : > { %v548_v45 = vadd.f32 %v544_v33, %v533_v31  ;;  %v550_v46 = vadd.f32 %v546_v34, %v535_v32  ;;  %v559_v51 = vmul.f32 %v804_v35, %v557_v40  ;;  %v561_v52 = vmul.f32 %v806_v36, %v557_v40 }
 0x14c   : > { %v607_v48 = vadd.f32 %v603_v6, %v592_v37  ;;  %v609_v50 = vadd.f32 %v605_v10, %v594_v38  ;;  %v635_v55 = vmul.f32 %v825_v39, %v631_v18  ;;  %v574_v56 = vmul.f32 %v808_v41, %v572_v43  ;;  %v822_v10 = vld [vmem:[%s1208_s9 + $0xf8] sm:$0xff] }
 0x14d   : > { %v576_v57 = vmul.f32 %v810_v42, %v572_v43  ;;  %v602_v58 = vperm.slane %v1256_v49, 6  ;;  %v563_v61 = vadd.f32 %v559_v51, %v548_v45  ;;  %v565_v62 = vadd.f32 %v561_v52, %v550_v46 }
 0x14e   : > { %v622_v59 = vadd.f32 %v618_v12, %v607_v48  ;;  %v624_v60 = vadd.f32 %v620_v28, %v609_v50  ;;  %v589_v0 = vmul.f32 %v812_v53, %v587_v47  ;;  %v591_v1 = vmul.f32 %v814_v54, %v587_v47 }
 0x14f   : > { %v617_v3 = vperm.slane %v1256_v49, 7  ;;  %v578_v6 = vadd.f32 %v574_v56, %v563_v61  ;;  %v580_v7 = vadd.f32 %v576_v57, %v565_v62  ;;  %v604_v8 = vmul.f32 %v816_v63, %v602_v58  ;;  %v824_v49 = vld [vmem:[%s1208_s9 + $0x108] sm:$0xff]  ;;  %s985_s9 = sshra.s32 %s663_s27, 4  ;;  %s986_s9 = int_to_ptr.hbm [resolvable:$true] %s985_s9 }
 0x150   : > { %v637_v4 = vadd.f32 %v633_v44, %v622_v59  ;;  %v639_v5 = vadd.f32 %v635_v55, %v624_v60  ;;  %v606_v13 = vmul.f32 %v818_v2, %v602_v58  ;;  %v632_v14 = vperm.slane %v1273_v30, 0  ;;  %s987_s21 = scalar_lea.hbm %s986_s9, 32  ;;  %p992_p7 = scmp.lt.s32.totalorder %s986_s9, %s1341_s7 }
 0x151   : > { %v593_v11 = vadd.f32 %v589_v0, %v578_v6  ;;  %v595_v12 = vadd.f32 %v591_v1, %v580_v7  ;;  %v619_v18 = vmul.f32 %v820_v9, %v617_v3  ;;  %v621_v19 = vmul.f32 %v822_v10, %v617_v3  ;;  %p988_p4 = scmp.ne.s32.totalorder %s986_s9, %s987_s21  ;;  %p993_p8 = scmp.lt.s32.totalorder %s991_s23, %s987_s21 }
 0x152   : > { %641 = vst [vmem:[%s362_s17] sm:$0xff] %v637_v4  ;;  %v634_v22 = vmul.f32 %v824_v49, %v632_v14  ;;  %v636_v23 = vmul.f32 %v826_v15, %v632_v14 }
 0x153   : > { %643 = vst [vmem:[%s362_s17 + $0x10] sm:$0xff] %v639_v5  ;;  %v608_v16 = vadd.f32 %v604_v8, %v593_v11  ;;  %v610_v17 = vadd.f32 %v606_v13, %v595_v12  ;;  %p989_p5 = pnand %p988_p4, %p1155_p9  ;;  %p994_p10 = por %p993_p8, %p992_p7 }
 0x155   : > { %v623_v20 = vadd.f32 %v619_v18, %v608_v16  ;;  %v625_v21 = vadd.f32 %v621_v19, %v610_v17  ;;  %p990_p6 = pneg %p989_p5 }
 0x157   : > { %v638_v24 = vadd.f32 %v634_v22, %v623_v20  ;;  %v640_v25 = vadd.f32 %v636_v23, %v625_v21  ;;  %p995_p13 = pnand %p994_p10, %p990_p6 }
 0x159   : > { %642 = vst [vmem:[%s362_s17 + $0x8] sm:$0xff] %v638_v24 }
 0x15a   : > { %644 = vst [vmem:[%s362_s17 + $0x18] sm:$0xff] %v640_v25 }
 0x15b   : > { %998 = shalt.err (!%p995_p13)
}
 0x15c   : > { %s1062_s30 = smov 256   ;;  %s1063_s0 = smov 16  }
 0x15d   : > { %841 = dma.vmem_to_hbm [thread:$0]  (%p1155_p9), %s661_s20, 512, %s663_s27, %s646_s8, %s1062_s30, %s1062_s30, %s1063_s0  }
 0x15e PF: > { %s677_s26 = sand.u32 1, %s1037_s24   ;;  %p851_p0 = pnand %p779_p12, %p1162_p11 }
 0x15f   : > { %s678_s15 = scalar_lea.sflag [#allocation4], %s677_s26 }
 0x160   : > { %p852_p1 = pneg %p851_p0 }
 0x162   : > { %1032 = dma.done.wait (%p852_p1), %s678_s15, 512  }
 0x163   : > { %1034 = vsyncadd (%p852_p1), %s678_s15, 4294966784  ;;  %s26_s29 = sadd.s32 1, %s1057_s29   ;;  %s1354_s17 = sld [smem:[#allocation11_spill]] }
 0x164   : > { %p23_p2 = scmp.ge.s32.totalorder %s26_s29, 4   ;;  %s1355_s26 = sld [smem:[#allocation13_spill]] }
 0x165   : > { %s1356_s14 = sld [smem:[#allocation12_spill]]  ;;  %s1357_s24 = smov %s1041_s25 }
 0x166   : > { %s1359_s27 = smov %s1053_s28 }
 0x167   :  { %25 = sbr.rel (!%p23_p2) target bundleno = 10 (0xa), region = 114 }
 0x169   : > { %s1358_s25 = smov %s1354_s17 }
 0x16b   : > { %s1360_s28 = smov %s1356_s14 }
 0x16c   :  { %684 = vsyncpa [#allocation3], 1 }
 0x16d   :  { %686 = vsyncpa [#allocation3 + $0x1], 1 }
 0x16e   :  { %687 = vsyncpa [#allocation6], 1 }
 0x16f   :  { %689 = vsyncpa [#allocation6 + $0x1], 1 }
 0x170   :  { %690 = vsyncpa [#allocation4], 1 }
 0x171   :  { %692 = vsyncpa [#allocation4 + $0x1], 1 }

</bundles_post_ra>
